<compile_context>
chip_gen: v5e
topology: v5e:2x2
jax: 0.10.0
libtpu: 0.0.40
codegen_flags: <defaults>
</compile_context>

<pallas_src>
import jax
import jax.numpy as jnp
from jax.experimental import pallas as pl
from jax.experimental.pallas import tpu as pltpu


IN_DIM = 784  # fixed by the module (MNIST-flattened input)


def _round_up(x, m):
    return ((x + m - 1) // m) * m


def _default_block_b():
    """Generation-aware default batch tile (multiple of 8)."""
    try:
        kind = jax.devices()[0].device_kind.lower()
    except Exception:
        return 1024
    if "v6" in kind:      # v6e: 32 MiB scoped / 128 MiB physical VMEM
        return 2048
    return 1024           # v5e (16 MiB scoped) / v7x (64 MiB physical) safe default


def _make_kernel(n_extra, n_components):
    """Ref order:
      x,
      w0_fused, b0_fused,
      [block-diagonal extra hidden: w, b] * n_extra,
      w_head, b_head,
      out (packed [TB, OUT_PAD])
    """

    def kernel(*refs):
        idx = 0
        x = refs[idx][...]
        idx += 1

        # Fused first layer: [TB, 784] @ [784, gate_size + gauss_size]
        w0 = refs[idx][...]
        b0 = refs[idx + 1][...]
        idx += 2
        hg = jnp.maximum(
            jnp.dot(x, w0, preferred_element_type=jnp.float32) + b0, 0.0
        )

        # Extra hidden layers: one lane-dense block-diagonal matmul each.
        for _ in range(n_extra):
            w = refs[idx][...]
            b = refs[idx + 1][...]
            idx += 2
            hg = jnp.maximum(
                jnp.dot(hg.astype(w.dtype), w, preferred_element_type=jnp.float32)
                + b,
                0.0,
            )

        # Fused head: block-structured [gate_size+gauss_size, OUT_PAD]
        #   lanes [0, K)           -> gate logits
        #   lanes [K, K+K*D)       -> means
        #   lanes [K+K*D, K+2*K*D) -> logvar   (remaining lanes are zero pad)
        wh = refs[idx][...]
        bh = refs[idx + 1][...]
        idx += 2
        out_ref = refs[idx]

        head = jnp.dot(
            hg.astype(wh.dtype), wh, preferred_element_type=jnp.float32
        ) + bh

        # Masked softmax over the gate lanes only; everything else passes through.
        lane = jax.lax.broadcasted_iota(jnp.int32, head.shape, 1)
        gmask = lane < n_components
        m = jnp.max(jnp.where(gmask, head, -jnp.inf), axis=-1, keepdims=True)
        e = jnp.exp(jnp.where(gmask, head - m, -jnp.inf))
        denom = jnp.sum(e, axis=-1, keepdims=True)
        gates = e / denom  # exact divide: VPU/EUP work is hidden under the x DMA

        out_ref[...] = jnp.where(gmask, gates, head).astype(out_ref.dtype)

    return kernel


def conditional_gmm2_forward(x, params, *, block_b=None):
    """params: dict with
         gate_hidden: list of (w[in,out], b[1,out])
         gate_out:    (w, b)
         gauss_hidden: list of (w, b)
         mean:        (w, b)
         logvar:      (w, b)
    Returns (gates [B, K], means [B, K, D], logvar [B, K, D]).
    """
    B = x.shape[0]
    compute_dtype = x.dtype  # accept bf16 inputs directly (no wrapper cast of x)

    gate_hidden = params["gate_hidden"]
    gauss_hidden = params["gauss_hidden"]
    gw0, gb0 = gate_hidden[0]
    hw0, hb0 = gauss_hidden[0]
    gate_size = gw0.shape[1]
    gauss_size = hw0.shape[1]
    gate_out_w, gate_out_b = params["gate_out"]
    mean_w, mean_b = params["mean"]
    logvar_w, logvar_b = params["logvar"]
    K = gate_out_w.shape[1]
    KD = mean_w.shape[1]
    D = KD // K
    hg_dim = gate_size + gauss_size

    # ---- wrapper-side weight packing (one-time, tiny) ----
    # Fused first layer: [784, GS+HS]
    w0f = jnp.concatenate([gw0, hw0], axis=1).astype(compute_dtype)
    b0f = jnp.concatenate([gb0, hb0], axis=1).astype(jnp.float32)

    # Extra hidden layers packed as block-diagonal [GS+HS, GS+HS] weights.
    # If one branch has fewer layers, its block is identity + zero bias,
    # which is exact because inputs are post-ReLU (non-negative).
    n_gate_extra = len(gate_hidden) - 1
    n_gauss_extra = len(gauss_hidden) - 1
    n_extra = max(n_gate_extra, n_gauss_extra)
    extra_packed = []
    for layer in range(n_extra):
        w = jnp.zeros((hg_dim, hg_dim), jnp.float32)
        b = jnp.zeros((1, hg_dim), jnp.float32)
        if layer < n_gate_extra:
            gw, gb = gate_hidden[layer + 1]
            w = w.at[:gate_size, :gate_size].set(gw)
            b = b.at[:, :gate_size].set(gb)
        else:
            w = w.at[:gate_size, :gate_size].set(jnp.eye(gate_size, dtype=jnp.float32))
        if layer < n_gauss_extra:
            hw, hb = gauss_hidden[layer + 1]
            w = w.at[gate_size:, gate_size:].set(hw)
            b = b.at[:, gate_size:].set(hb)
        else:
            w = w.at[gate_size:, gate_size:].set(jnp.eye(gauss_size, dtype=jnp.float32))
        extra_packed.append((w.astype(compute_dtype), b))

    # Fused, lane-padded head: [GS+HS, OUT_PAD]
    out_width = K + 2 * KD
    out_pad = _round_up(max(out_width, 128), 128)
    wh = jnp.zeros((hg_dim, out_pad), jnp.float32)
    wh = wh.at[:gate_size, :K].set(gate_out_w)
    wh = wh.at[gate_size:, K:K + KD].set(mean_w)
    wh = wh.at[gate_size:, K + KD:K + 2 * KD].set(logvar_w)
    wh = wh.astype(compute_dtype)
    bh = jnp.zeros((1, out_pad), jnp.float32)
    bh = bh.at[:, :K].set(gate_out_b)
    bh = bh.at[:, K:K + KD].set(mean_b)
    bh = bh.at[:, K + KD:K + 2 * KD].set(logvar_b)

    # ---- batch tiling (no padding of x; partial last block handled by Pallas) ----
    if block_b is None:
        block_b = _default_block_b()
    two_step = _round_up(max(1, -(-B // 2)), 8)   # ~ceil(B/2) rounded to 8: >=2 grid
    TB = max(8, min(int(block_b), two_step, _round_up(B, 8)))  # steps when possible
    grid = (pl.cdiv(B, TB),)

    flat = [x, w0f, b0f]
    for (w, b) in extra_packed:
        flat += [w, b]
    flat += [wh, bh]

    kernel = _make_kernel(n_extra, K)

    in_specs = [pl.BlockSpec((TB, IN_DIM), lambda i: (i, 0))]
    for op in flat[1:]:
        # Weights stay resident in VMEM: constant block index across the grid.
        in_specs.append(pl.BlockSpec(op.shape, lambda i: (0, 0)))

    # Explicit VMEM budget: double-buffered x tile + double-buffered out tile
    # + (conservatively double-buffered) resident weights + headroom.
    weight_bytes = sum(int(a.size) * int(a.dtype.itemsize) for a in flat[1:])
    vmem_limit = int(
        2 * TB * IN_DIM * x.dtype.itemsize
        + 2 * TB * out_pad * 4
        + 2 * weight_bytes
        + (4 << 20)
    )
    vmem_limit = max(16 << 20, min(vmem_limit, 48 << 20))

    out = pl.pallas_call(
        kernel,
        out_shape=jax.ShapeDtypeStruct((B, out_pad), jnp.float32),
        grid=grid,
        in_specs=in_specs,
        out_specs=pl.BlockSpec((TB, out_pad), lambda i: (i, 0)),
        compiler_params=pltpu.CompilerParams(
            dimension_semantics=("parallel",),
            vmem_limit_bytes=vmem_limit,
        ),
    )(*flat)

    gates = out[:, :K]
    means = out[:, K:K + KD].reshape(B, K, D)
    logvar = out[:, K + KD:K + 2 * KD].reshape(B, K, D)
    return gates, means, logvar


# ----------------------- deterministic parameter init -----------------------

def _linear_params(key, fan_in, fan_out, bias_override=None):
    """PyTorch nn.Linear default init: U(-1/sqrt(fan_in), 1/sqrt(fan_in)).
    Weight returned already transposed to [in, out]; bias as [1, out]."""
    kw, kb = jax.random.split(key)
    bound = 1.0 / jnp.sqrt(jnp.float32(fan_in))
    w = jax.random.uniform(kw, (fan_in, fan_out), jnp.float32, -bound, bound)
    if bias_override is not None:
        b = jnp.asarray(bias_override, jnp.float32).reshape(1, fan_out)
    else:
        b = jax.random.uniform(kb, (1, fan_out), jnp.float32, -bound, bound)
    return w, b


def init_conditional_gmm2(
    key,
    num_layers_gate,
    gate_size,
    num_layers_gaussian,
    gaussian_size,
    n_components,
    dim,
    init_bias_gate=None,
):
    keys = jax.random.split(key, num_layers_gate + 1 + num_layers_gaussian + 2)
    ki = iter(keys)

    gate_hidden = []
    in_d = IN_DIM
    for _ in range(num_layers_gate):
        gate_hidden.append(_linear_params(next(ki), in_d, gate_size))
        in_d = gate_size
    gate_out = _linear_params(
        next(ki), gate_size, n_components, bias_override=init_bias_gate
    )

    gauss_hidden = []
    in_d = IN_DIM
    for _ in range(num_layers_gaussian):
        gauss_hidden.append(_linear_params(next(ki), in_d, gaussian_size))
        in_d = gaussian_size
    mean = _linear_params(next(ki), gaussian_size, n_components * dim)
    logvar = _linear_params(next(ki), gaussian_size, n_components * dim)
    # TODO(synk): GaussianNN2.fc0 is defined in __init__ but never used in forward; omitted.

    return {
        "gate_hidden": gate_hidden,
        "gate_out": gate_out,
        "gauss_hidden": gauss_hidden,
        "mean": mean,
        "logvar": logvar,
    }


# ----------------------------- pure-JAX reference ----------------------------

def _reference_forward(x, params, n_components, dim):
    h = x
    for (w, b) in params["gate_hidden"]:
        h = jnp.maximum(h @ w + b, 0.0)
    w, b = params["gate_out"]
    gates = jax.nn.softmax(h @ w + b, axis=-1)

    g = x
    for (w, b) in params["gauss_hidden"]:
        g = jnp.maximum(g @ w + b, 0.0)
    wm, bm = params["mean"]
    wl, bl = params["logvar"]
    means = (g @ wm + bm).reshape(-1, n_components, dim)
    logvar = (g @ wl + bl).reshape(-1, n_components, dim)
    return gates, means, logvar


if __name__ == "__main__":
    n_components = 4
    dim = 2
    init_bias_gate = [0.0] * n_components

    root = jax.random.PRNGKey(0)
    k_params, k_x = jax.random.split(root)

    # (num_layers_gate, num_layers_gaussian, batch) configurations:
    #  - asymmetric layer counts exercise the identity pass-through block-diag path
    #  - B=10 exercises the partial last grid block (no wrapper padding of x)
    cases = [(2, 3, 8), (2, 3, 10), (1, 1, 10)]

    ok = True
    for (nlg, nlh, B) in cases:
        params = init_conditional_gmm2(
            jax.random.fold_in(k_params, 17 * nlg + nlh),
            nlg, 32, nlh, 32, n_components, dim,
            init_bias_gate=init_bias_gate,
        )
        kx = jax.random.fold_in(k_x, 100 * nlg + 10 * nlh + B)
        x = jax.random.normal(kx, (B, IN_DIM), jnp.float32)

        gates, means, logvar = conditional_gmm2_forward(x, params)
        jax.block_until_ready((gates, means, logvar))

        rg, rm, rl = _reference_forward(x, params, n_components, dim)
        assert gates.shape == (B, n_components)
        assert means.shape == (B, n_components, dim)
        assert logvar.shape == (B, n_components, dim)
        ok &= bool(jnp.allclose(gates, rg, atol=2e-4, rtol=2e-4))
        ok &= bool(jnp.allclose(means, rm, atol=2e-4, rtol=2e-4))
        ok &= bool(jnp.allclose(logvar, rl, atol=2e-4, rtol=2e-4))

    assert ok
    print("KERNEL_OK")
</pallas_src>

<mosaic_0001>
module attributes {stable_mosaic.version = 11 : i64} {
  func.func @kernel(%arg0: i32, %arg1: memref<8x784xf32, #tpu.memory_space<vmem>>, %arg2: memref<784x64xf32, #tpu.memory_space<vmem>>, %arg3: memref<1x64xf32, #tpu.memory_space<vmem>>, %arg4: memref<64x64xf32, #tpu.memory_space<vmem>>, %arg5: memref<1x64xf32, #tpu.memory_space<vmem>>, %arg6: memref<64x64xf32, #tpu.memory_space<vmem>>, %arg7: memref<1x64xf32, #tpu.memory_space<vmem>>, %arg8: memref<64x128xf32, #tpu.memory_space<vmem>>, %arg9: memref<1x128xf32, #tpu.memory_space<vmem>>, %arg10: memref<8x128xf32, #tpu.memory_space<vmem>>) attributes {dimension_semantics = [#tpu.dimension_semantics<parallel>], iteration_bounds = array<i64: 1>, scalar_prefetch = 0 : i64, scratch_operands = 0 : i64, tpu.core_type = #tpu.core_type<tc>, window_params = [{transform_indices = @transform_0, window_bounds = array<i64: 8, 784>}, {pipeline_mode = #tpu.pipeline_mode<synchronous>, transform_indices = @transform_1, window_bounds = array<i64: 784, 64>}, {pipeline_mode = #tpu.pipeline_mode<synchronous>, transform_indices = @transform_2, window_bounds = array<i64: 1, 64>}, {pipeline_mode = #tpu.pipeline_mode<synchronous>, transform_indices = @transform_3, window_bounds = array<i64: 64, 64>}, {pipeline_mode = #tpu.pipeline_mode<synchronous>, transform_indices = @transform_4, window_bounds = array<i64: 1, 64>}, {pipeline_mode = #tpu.pipeline_mode<synchronous>, transform_indices = @transform_5, window_bounds = array<i64: 64, 64>}, {pipeline_mode = #tpu.pipeline_mode<synchronous>, transform_indices = @transform_6, window_bounds = array<i64: 1, 64>}, {pipeline_mode = #tpu.pipeline_mode<synchronous>, transform_indices = @transform_7, window_bounds = array<i64: 64, 128>}, {pipeline_mode = #tpu.pipeline_mode<synchronous>, transform_indices = @transform_8, window_bounds = array<i64: 1, 128>}, {transform_indices = @transform_9, window_bounds = array<i64: 8, 128>}]} {
    %c0 = arith.constant 0 : index
    %c0_0 = arith.constant 0 : index
    %0 = vector.load %arg1[%c0, %c0_0] : memref<8x784xf32, #tpu.memory_space<vmem>>, vector<8x784xf32>
    %c0_1 = arith.constant 0 : index
    %c0_2 = arith.constant 0 : index
    %1 = vector.load %arg2[%c0_1, %c0_2] : memref<784x64xf32, #tpu.memory_space<vmem>>, vector<784x64xf32>
    %c0_3 = arith.constant 0 : index
    %c0_4 = arith.constant 0 : index
    %2 = vector.load %arg3[%c0_3, %c0_4] : memref<1x64xf32, #tpu.memory_space<vmem>>, vector<1x64xf32>
    %cst = arith.constant dense<0.000000e+00> : vector<8x64xf32>
    %3 = tpu.matmul %0, %1, %cst {dimension_numbers = #tpu.dot_dimension_numbers<[1], [0], [0], [1], [0, 0, 1, 1], [], []>} : vector<8x784xf32>, vector<784x64xf32>, vector<8x64xf32> -> vector<8x64xf32>
    %4 = vector.broadcast %2 : vector<1x64xf32> to vector<8x64xf32>
    %5 = arith.addf %3, %4 : vector<8x64xf32>
    %cst_5 = arith.constant 0.000000e+00 : f32
    %6 = vector.broadcast %cst_5 : f32 to vector<8x64xf32>
    %7 = arith.maximumf %5, %6 : vector<8x64xf32>
    %c0_6 = arith.constant 0 : index
    %c0_7 = arith.constant 0 : index
    %8 = vector.load %arg4[%c0_6, %c0_7] : memref<64x64xf32, #tpu.memory_space<vmem>>, vector<64x64xf32>
    %c0_8 = arith.constant 0 : index
    %c0_9 = arith.constant 0 : index
    %9 = vector.load %arg5[%c0_8, %c0_9] : memref<1x64xf32, #tpu.memory_space<vmem>>, vector<1x64xf32>
    %cst_10 = arith.constant dense<0.000000e+00> : vector<8x64xf32>
    %10 = tpu.matmul %7, %8, %cst_10 {dimension_numbers = #tpu.dot_dimension_numbers<[1], [0], [0], [1], [0, 0, 1, 1], [], []>} : vector<8x64xf32>, vector<64x64xf32>, vector<8x64xf32> -> vector<8x64xf32>
    %11 = vector.broadcast %9 : vector<1x64xf32> to vector<8x64xf32>
    %12 = arith.addf %10, %11 : vector<8x64xf32>
    %cst_11 = arith.constant 0.000000e+00 : f32
    %13 = vector.broadcast %cst_11 : f32 to vector<8x64xf32>
    %14 = arith.maximumf %12, %13 : vector<8x64xf32>
    %c0_12 = arith.constant 0 : index
    %c0_13 = arith.constant 0 : index
    %15 = vector.load %arg6[%c0_12, %c0_13] : memref<64x64xf32, #tpu.memory_space<vmem>>, vector<64x64xf32>
    %c0_14 = arith.constant 0 : index
    %c0_15 = arith.constant 0 : index
    %16 = vector.load %arg7[%c0_14, %c0_15] : memref<1x64xf32, #tpu.memory_space<vmem>>, vector<1x64xf32>
    %cst_16 = arith.constant dense<0.000000e+00> : vector<8x64xf32>
    %17 = tpu.matmul %14, %15, %cst_16 {dimension_numbers = #tpu.dot_dimension_numbers<[1], [0], [0], [1], [0, 0, 1, 1], [], []>} : vector<8x64xf32>, vector<64x64xf32>, vector<8x64xf32> -> vector<8x64xf32>
    %18 = vector.broadcast %16 : vector<1x64xf32> to vector<8x64xf32>
    %19 = arith.addf %17, %18 : vector<8x64xf32>
    %cst_17 = arith.constant 0.000000e+00 : f32
    %20 = vector.broadcast %cst_17 : f32 to vector<8x64xf32>
    %21 = arith.maximumf %19, %20 : vector<8x64xf32>
    %c0_18 = arith.constant 0 : index
    %c0_19 = arith.constant 0 : index
    %22 = vector.load %arg8[%c0_18, %c0_19] : memref<64x128xf32, #tpu.memory_space<vmem>>, vector<64x128xf32>
    %c0_20 = arith.constant 0 : index
    %c0_21 = arith.constant 0 : index
    %23 = vector.load %arg9[%c0_20, %c0_21] : memref<1x128xf32, #tpu.memory_space<vmem>>, vector<1x128xf32>
    %cst_22 = arith.constant dense<0.000000e+00> : vector<8x128xf32>
    %24 = tpu.matmul %21, %22, %cst_22 {dimension_numbers = #tpu.dot_dimension_numbers<[1], [0], [0], [1], [0, 0, 1, 1], [], []>} : vector<8x64xf32>, vector<64x128xf32>, vector<8x128xf32> -> vector<8x128xf32>
    %25 = vector.broadcast %23 : vector<1x128xf32> to vector<8x128xf32>
    %26 = arith.addf %24, %25 : vector<8x128xf32>
    %27 = tpu.iota {dimensions = array<i32: 1>} : vector<8x128xi32>
    %c4_i32 = arith.constant 4 : i32
    %28 = vector.broadcast %c4_i32 : i32 to vector<8x128xi32>
    %29 = arith.cmpi slt, %27, %28 : vector<8x128xi32>
    %cst_23 = arith.constant 0xFF800000 : f32
    %30 = vector.broadcast %cst_23 : f32 to vector<8x128xf32>
    %31 = arith.select %29, %26, %30 : vector<8x128xi1>, vector<8x128xf32>
    %cst_24 = arith.constant dense<0xFF800000> : vector<8xf32>
    %32 = vector.multi_reduction <maximumf>, %31, %cst_24 [1] : vector<8x128xf32> to vector<8xf32>
    %33 = vector.shape_cast %32 : vector<8xf32> to vector<8x1xf32>
    %34 = vector.broadcast %33 : vector<8x1xf32> to vector<8x128xf32>
    %35 = arith.subf %26, %34 : vector<8x128xf32>
    %cst_25 = arith.constant 0xFF800000 : f32
    %36 = vector.broadcast %cst_25 : f32 to vector<8x128xf32>
    %37 = arith.select %29, %35, %36 : vector<8x128xi1>, vector<8x128xf32>
    %38 = math.exp %37 : vector<8x128xf32>
    %cst_26 = arith.constant dense<0.000000e+00> : vector<8xf32>
    %39 = vector.multi_reduction <add>, %38, %cst_26 [1] : vector<8x128xf32> to vector<8xf32>
    %40 = vector.shape_cast %39 : vector<8xf32> to vector<8x1xf32>
    %41 = vector.broadcast %40 : vector<8x1xf32> to vector<8x128xf32>
    %42 = arith.divf %38, %41 : vector<8x128xf32>
    %43 = arith.select %29, %42, %26 : vector<8x128xi1>, vector<8x128xf32>
    %c0_27 = arith.constant 0 : index
    %c0_28 = arith.constant 0 : index
    %44 = vector.load %arg10[%c0_27, %c0_28] : memref<8x128xf32, #tpu.memory_space<vmem>>, vector<8x128xf32>
    tpu.vector_store %arg10[%c0_27, %c0_28], %43 {strides = array<i32>} : memref<8x128xf32, #tpu.memory_space<vmem>>, vector<8x128xf32>,
    return
  }
  func.func @transform_0(%arg0: i32) -> (i32, i32) {
    %c0_i32 = arith.constant 0 : i32
    %c0_i32_0 = arith.constant 0 : i32
    return %arg0, %c0_i32 : i32, i32
  }
  func.func @transform_1(%arg0: i32) -> (i32, i32) {
    %c0_i32 = arith.constant 0 : i32
    %c0_i32_0 = arith.constant 0 : i32
    %c0_i32_1 = arith.constant 0 : i32
    return %c0_i32, %c0_i32_0 : i32, i32
  }
  func.func @transform_2(%arg0: i32) -> (i32, i32) {
    %c0_i32 = arith.constant 0 : i32
    %c0_i32_0 = arith.constant 0 : i32
    %c0_i32_1 = arith.constant 0 : i32
    return %c0_i32, %c0_i32_0 : i32, i32
  }
  func.func @transform_3(%arg0: i32) -> (i32, i32) {
    %c0_i32 = arith.constant 0 : i32
    %c0_i32_0 = arith.constant 0 : i32
    %c0_i32_1 = arith.constant 0 : i32
    return %c0_i32, %c0_i32_0 : i32, i32
  }
  func.func @transform_4(%arg0: i32) -> (i32, i32) {
    %c0_i32 = arith.constant 0 : i32
    %c0_i32_0 = arith.constant 0 : i32
    %c0_i32_1 = arith.constant 0 : i32
    return %c0_i32, %c0_i32_0 : i32, i32
  }
  func.func @transform_5(%arg0: i32) -> (i32, i32) {
    %c0_i32 = arith.constant 0 : i32
    %c0_i32_0 = arith.constant 0 : i32
    %c0_i32_1 = arith.constant 0 : i32
    return %c0_i32, %c0_i32_0 : i32, i32
  }
  func.func @transform_6(%arg0: i32) -> (i32, i32) {
    %c0_i32 = arith.constant 0 : i32
    %c0_i32_0 = arith.constant 0 : i32
    %c0_i32_1 = arith.constant 0 : i32
    return %c0_i32, %c0_i32_0 : i32, i32
  }
  func.func @transform_7(%arg0: i32) -> (i32, i32) {
    %c0_i32 = arith.constant 0 : i32
    %c0_i32_0 = arith.constant 0 : i32
    %c0_i32_1 = arith.constant 0 : i32
    return %c0_i32, %c0_i32_0 : i32, i32
  }
  func.func @transform_8(%arg0: i32) -> (i32, i32) {
    %c0_i32 = arith.constant 0 : i32
    %c0_i32_0 = arith.constant 0 : i32
    %c0_i32_1 = arith.constant 0 : i32
    return %c0_i32, %c0_i32_0 : i32, i32
  }
  func.func @transform_9(%arg0: i32) -> (i32, i32) {
    %c0_i32 = arith.constant 0 : i32
    %c0_i32_0 = arith.constant 0 : i32
    return %arg0, %c0_i32 : i32, i32
  }
}

</mosaic_0001>

<bundles_post_ra>
// kernel: tpu_custom_call.1
= control target key start
LH: loop header
LB: loop body
LE: loop exit
PB: predicated region body
PF: predicated region fallthrough
CT: control target
= control target key end

     0   :  { %s938_s0 = inlined_call_operand.vmem [shape: f32[8,784], index: 0, kind: input, shape index: {}]   ;;  %s939_s1 = inlined_call_operand.vmem [shape: f32[784,64], index: 1, kind: input, shape index: {}]   ;;  %s940_s2 = inlined_call_operand.vmem [shape: f32[1,64], index: 2, kind: input, shape index: {}]   ;;  %s941_s3 = inlined_call_operand.vmem [shape: f32[64,64], index: 3, kind: input, shape index: {}]   ;;  %s942_s4 = inlined_call_operand.vmem [shape: f32[1,64], index: 4, kind: input, shape index: {}]   ;;  %s943_s5 = inlined_call_operand.vmem [shape: f32[64,64], index: 5, kind: input, shape index: {}]   ;;  %s944_s6 = inlined_call_operand.vmem [shape: f32[1,64], index: 6, kind: input, shape index: {}]   ;;  %s945_s7 = inlined_call_operand.vmem [shape: f32[64,128], index: 7, kind: input, shape index: {}]   ;;  %s946_s8 = inlined_call_operand.vmem [shape: f32[1,128], index: 8, kind: input, shape index: {}]   ;;  %s947_s9 = inlined_call_operand.hbm [shape: f32[8,128], index: 9, kind: output, shape index: {}]  }
   0x1   :  { %v55_v0 = vld [vmem:[%s939_s1 + $0x78] sm:$0xff]  ;;  %v54_v1 = vld [vmem:[%s939_s1 + $0x70] sm:$0xff]  ;;  %v53_v4 = vld [vmem:[%s939_s1 + $0x68] sm:$0xff] }
   0x2   :  { %v71_v2 = vld [vmem:[%s939_s1 + $0xf8] sm:$0xff]  ;;  %146 = vmatpush.msra.mxu0 %v55_v0  ;;  %v70_v3 = vld [vmem:[%s939_s1 + $0xf0] sm:$0xff]  ;;  %v69_v5 = vld [vmem:[%s939_s1 + $0xe8] sm:$0xff] }
   0x3   :  { %166 = vmatpush.msra.mxu1 %v71_v2  ;;  %v52_v6 = vld [vmem:[%s939_s1 + $0x60] sm:$0xff]  ;;  %v51_v8 = vld [vmem:[%s939_s1 + $0x58] sm:$0xff]  ;;  %v50_v10 = vld [vmem:[%s939_s1 + $0x50] sm:$0xff] }
   0x4   :  { %147 = vmatpush.msra.mxu0 %v54_v1  ;;  %v68_v7 = vld [vmem:[%s939_s1 + $0xe0] sm:$0xff]  ;;  %v67_v9 = vld [vmem:[%s939_s1 + $0xd8] sm:$0xff]  ;;  %v66_v12 = vld [vmem:[%s939_s1 + $0xd0] sm:$0xff] }
   0x5   :  { %167 = vmatpush.msra.mxu1 %v70_v3  ;;  %v87_v11 = vld [vmem:[%s939_s1 + $0x178] sm:$0xff]  ;;  %v86_v13 = vld [vmem:[%s939_s1 + $0x170] sm:$0xff]  ;;  %v85_v15 = vld [vmem:[%s939_s1 + $0x168] sm:$0xff] }
   0x6   :  { %148 = vmatpush.msra.mxu0 %v53_v4  ;;  %186 = vmatpush.msra.mxu2 %v87_v11  ;;  %v103_v14 = vld [vmem:[%s939_s1 + $0x1f8] sm:$0xff]  ;;  %v102_v16 = vld [vmem:[%s939_s1 + $0x1f0] sm:$0xff]  ;;  %v49_v17 = vld [vmem:[%s939_s1 + $0x48] sm:$0xff] }
   0x7   :  { %168 = vmatpush.msra.mxu1 %v69_v5  ;;  %v65_v18 = vld [vmem:[%s939_s1 + $0xc8] sm:$0xff]  ;;  %206 = vmatpush.msra.mxu3 %v103_v14  ;;  %v84_v19 = vld [vmem:[%s939_s1 + $0x160] sm:$0xff]  ;;  %v83_v23 = vld [vmem:[%s939_s1 + $0x158] sm:$0xff] }
   0x8   :  { %149 = vmatpush.msra.mxu0 %v52_v6  ;;  %187 = vmatpush.msra.mxu2 %v86_v13  ;;  %v101_v20 = vld [vmem:[%s939_s1 + $0x1e8] sm:$0xff]  ;;  %v48_v21 = vld [vmem:[%s939_s1 + $0x40] sm:$0xff]  ;;  %v47_v25 = vld [vmem:[%s939_s1 + $0x38] sm:$0xff] }
   0x9   :  { %169 = vmatpush.msra.mxu1 %v68_v7  ;;  %v64_v22 = vld [vmem:[%s939_s1 + $0xc0] sm:$0xff]  ;;  %207 = vmatpush.msra.mxu3 %v102_v16  ;;  %v63_v26 = vld [vmem:[%s939_s1 + $0xb8] sm:$0xff]  ;;  %v82_v27 = vld [vmem:[%s939_s1 + $0x150] sm:$0xff] }
   0xa   :  { %150 = vmatpush.msra.mxu0 %v51_v8  ;;  %188 = vmatpush.msra.mxu2 %v85_v15  ;;  %v100_v24 = vld [vmem:[%s939_s1 + $0x1e0] sm:$0xff]  ;;  %v99_v28 = vld [vmem:[%s939_s1 + $0x1d8] sm:$0xff]  ;;  %v46_v29 = vld [vmem:[%s939_s1 + $0x30] sm:$0xff] }
   0xb   :  { %170 = vmatpush.msra.mxu1 %v67_v9  ;;  %208 = vmatpush.msra.mxu3 %v101_v20  ;;  %v62_v30 = vld [vmem:[%s939_s1 + $0xb0] sm:$0xff]  ;;  %v81_v31 = vld [vmem:[%s939_s1 + $0x148] sm:$0xff]  ;;  %v80_v35 = vld [vmem:[%s939_s1 + $0x140] sm:$0xff] }
   0xc   :  { %151 = vmatpush.msra.mxu0 %v50_v10  ;;  %189 = vmatpush.msra.mxu2 %v84_v19  ;;  %v98_v32 = vld [vmem:[%s939_s1 + $0x1d0] sm:$0xff]  ;;  %v45_v33 = vld [vmem:[%s939_s1 + $0x28] sm:$0xff]  ;;  %v44_v37 = vld [vmem:[%s939_s1 + $0x20] sm:$0xff] }
   0xd   :  { %171 = vmatpush.msra.mxu1 %v66_v12  ;;  %209 = vmatpush.msra.mxu3 %v100_v24  ;;  %v61_v34 = vld [vmem:[%s939_s1 + $0xa8] sm:$0xff]  ;;  %v60_v38 = vld [vmem:[%s939_s1 + $0xa0] sm:$0xff]  ;;  %v79_v39 = vld [vmem:[%s939_s1 + $0x138] sm:$0xff] }
   0xe   :  { %152 = vmatpush.msra.mxu0 %v49_v17  ;;  %190 = vmatpush.msra.mxu2 %v83_v23  ;;  %v97_v36 = vld [vmem:[%s939_s1 + $0x1c8] sm:$0xff]  ;;  %v96_v40 = vld [vmem:[%s939_s1 + $0x1c0] sm:$0xff]  ;;  %v43_v41 = vld [vmem:[%s939_s1 + $0x18] sm:$0xff] }
   0xf   :  { %172 = vmatpush.msra.mxu1 %v65_v18  ;;  %210 = vmatpush.msra.mxu3 %v99_v28  ;;  %v59_v42 = vld [vmem:[%s939_s1 + $0x98] sm:$0xff]  ;;  %v78_v43 = vld [vmem:[%s939_s1 + $0x130] sm:$0xff]  ;;  %v77_v47 = vld [vmem:[%s939_s1 + $0x128] sm:$0xff] }
  0x10   :  { %153 = vmatpush.msra.mxu0 %v48_v21  ;;  %191 = vmatpush.msra.mxu2 %v82_v27  ;;  %v95_v44 = vld [vmem:[%s939_s1 + $0x1b8] sm:$0xff]  ;;  %v42_v45 = vld [vmem:[%s939_s1 + $0x10] sm:$0xff]  ;;  %v41_v49 = vld [vmem:[%s939_s1 + $0x8] sm:$0xff] }
  0x11   :  { %173 = vmatpush.msra.mxu1 %v64_v22  ;;  %211 = vmatpush.msra.mxu3 %v98_v32  ;;  %v58_v46 = vld [vmem:[%s939_s1 + $0x90] sm:$0xff]  ;;  %v57_v50 = vld [vmem:[%s939_s1 + $0x88] sm:$0xff]  ;;  %v76_v51 = vld [vmem:[%s939_s1 + $0x120] sm:$0xff] }
  0x12   :  { %154 = vmatpush.msra.mxu0 %v47_v25  ;;  %192 = vmatpush.msra.mxu2 %v81_v31  ;;  %v94_v48 = vld [vmem:[%s939_s1 + $0x1b0] sm:$0xff]  ;;  %v93_v52 = vld [vmem:[%s939_s1 + $0x1a8] sm:$0xff]  ;;  %v40_v53 = vld [vmem:[%s939_s1] sm:$0xff] }
  0x13   :  { %174 = vmatpush.msra.mxu1 %v63_v26  ;;  %212 = vmatpush.msra.mxu3 %v97_v36  ;;  %v56_v54 = vld [vmem:[%s939_s1 + $0x80] sm:$0xff]  ;;  %v119_v55 = vld [vmem:[%s939_s1 + $0x278] sm:$0xff]  ;;  %v118_v59 = vld [vmem:[%s939_s1 + $0x270] sm:$0xff] }
  0x14   :  { %155 = vmatpush.msra.mxu0 %v46_v29  ;;  %193 = vmatpush.msra.mxu2 %v80_v35  ;;  %v135_v56 = vld [vmem:[%s939_s1 + $0x2f8] sm:$0xff]  ;;  %v92_v58 = vld [vmem:[%s939_s1 + $0x1a0] sm:$0xff]  ;;  %v134_v60 = vld [vmem:[%s939_s1 + $0x2f0] sm:$0xff] }
  0x15   :  { %175 = vmatpush.msra.mxu1 %v62_v30  ;;  %213 = vmatpush.msra.mxu3 %v96_v40  ;;  %v75_v57 = vld [vmem:[%s939_s1 + $0x118] sm:$0xff]  ;;  %v117_v61 = vld [vmem:[%s939_s1 + $0x268] sm:$0xff]  ;;  %v74_v62 = vld [vmem:[%s939_s1 + $0x110] sm:$0xff] }
  0x16   :  { %156 = vmatpush.msra.mxu0 %v45_v33  ;;  %194 = vmatpush.msra.mxu2 %v79_v39  ;;  %v91_v63 = vld [vmem:[%s939_s1 + $0x198] sm:$0xff]  ;;  %v116_v0 = vld [vmem:[%s939_s1 + $0x260] sm:$0xff]  ;;  %v133_v1 = vld [vmem:[%s939_s1 + $0x2e8] sm:$0xff] }
  0x17   :  { %176 = vmatpush.msra.mxu1 %v61_v34  ;;  %214 = vmatpush.msra.mxu3 %v95_v44  ;;  %v132_v2 = vld [vmem:[%s939_s1 + $0x2e0] sm:$0xff]  ;;  %v73_v3 = vld [vmem:[%s939_s1 + $0x108] sm:$0xff]  ;;  %v90_v4 = vld [vmem:[%s939_s1 + $0x190] sm:$0xff] }
  0x18   :  { %157 = vmatpush.msra.mxu0 %v44_v37  ;;  %195 = vmatpush.msra.mxu2 %v78_v43  ;;  %v72_v5 = vld [vmem:[%s939_s1 + $0x100] sm:$0xff]  ;;  %v89_v6 = vld [vmem:[%s939_s1 + $0x188] sm:$0xff] }
  0x19   :  { %177 = vmatpush.msra.mxu1 %v60_v38  ;;  %215 = vmatpush.msra.mxu3 %v94_v48 }
  0x1a   :  { %158 = vmatpush.msra.mxu0 %v43_v41  ;;  %196 = vmatpush.msra.mxu2 %v77_v47 }
  0x1b   :  { %178 = vmatpush.msra.mxu1 %v59_v42  ;;  %216 = vmatpush.msra.mxu3 %v93_v52 }
  0x1c   :  { %159 = vmatpush.msra.mxu0 %v42_v45  ;;  %197 = vmatpush.msra.mxu2 %v76_v51 }
  0x1d   :  { %179 = vmatpush.msra.mxu1 %v58_v46  ;;  %217 = vmatpush.msra.mxu3 %v92_v58 }
  0x1e   :  { %160 = vmatpush.msra.mxu0 %v41_v49  ;;  %198 = vmatpush.msra.mxu2 %v75_v57 }
  0x1f   :  { %180 = vmatpush.msra.mxu1 %v57_v50  ;;  %218 = vmatpush.msra.mxu3 %v91_v63 }
  0x20   :  { %161 = vmatpush.msra.mxu0 %v40_v53  ;;  %199 = vmatpush.msra.mxu2 %v74_v62 }
  0x21   :  { %181 = vmatpush.msra.mxu1 %v56_v54 }
  0x22   :  { %226 = vmatpush.msrb.mxu0 %v119_v55 }
  0x23   :  { %246 = vmatpush.msrb.mxu1 %v135_v56 }
  0x24   :  { %227 = vmatpush.msrb.mxu0 %v118_v59 }
  0x25   :  { %247 = vmatpush.msrb.mxu1 %v134_v60 }
  0x26   :  { %228 = vmatpush.msrb.mxu0 %v117_v61 }
  0x27   :  { %248 = vmatpush.msrb.mxu1 %v133_v1 }
  0x28   :  { %14 = vsyncpa [#allocation3], 0  ;;  %v115_v7 = vld [vmem:[%s939_s1 + $0x258] sm:$0xff]  ;;  %200 = vmatpush.msra.mxu2 %v73_v3  ;;  %219 = vmatpush.msra.mxu3 %v90_v4  ;;  %v35_v9 = vld [vmem:[%s938_s0 + $0x10] sm:$0xff]  ;;  %vm142_vm0 = vcmask 130048   ;;  %vm299_vm1 = vcmask 523264  }
  0x29   :  { %v131_v8 = vld [vmem:[%s939_s1 + $0x2d8] sm:$0xff]  ;;  %229 = vmatpush.msrb.mxu0 %v116_v0  ;;  %249 = vmatpush.msrb.mxu1 %v132_v2  ;;  %v88_v10 = vld [vmem:[%s939_s1 + $0x180] sm:$0xff]  ;;  %v114_v11 = vld [vmem:[%s939_s1 + $0x250] sm:$0xff]  ;;  %s431_s13 = sshll.u32 %s947_s9, 4  ;;  %s432_s13 = int_to_ptr.hbm [resolvable:$true] %s431_s13 }
  0x2a   :  { %v130_v12 = vld [vmem:[%s939_s1 + $0x2d0] sm:$0xff]  ;;  %201 = vmatpush.msra.mxu2 %v72_v5  ;;  %220 = vmatpush.msra.mxu3 %v89_v6  ;;  %v137_v13 = vld [vmem:[%s939_s1 + $0x308] sm:$0xff]  ;;  %v33_v14 = vld [vmem:[%s938_s0] sm:$0xff] }
  0x2b   :  { %230 = vmatpush.msrb.mxu0 %v115_v7  ;;  %250 = vmatpush.msrb.mxu1 %v131_v8  ;;  %v113_v15 = vld [vmem:[%s939_s1 + $0x248] sm:$0xff]  ;;  %v36_v17 = vld [vmem:[%s938_s0 + $0x18] sm:$0xff]  ;;  %v112_v19 = vld [vmem:[%s939_s1 + $0x240] sm:$0xff] }
  0x2c   :  { %v129_v16 = vld [vmem:[%s939_s1 + $0x2c8] sm:$0xff]  ;;  %202 = vmatmul.f32.vlgmr.msra.gmra.mxu2 %v35_v9  ;;  %221 = vmatpush.msra.mxu3 %v88_v10  ;;  %v128_v20 = vld [vmem:[%s939_s1 + $0x2c0] sm:$0xff]  ;;  %v111_v22 = vld [vmem:[%s939_s1 + $0x238] sm:$0xff] }
  0x2d   :  { %231 = vmatpush.msrb.mxu0 %v114_v11  ;;  %251 = vmatpush.msrb.mxu1 %v130_v12  ;;  %v34_v18 = vld [vmem:[%s938_s0 + $0x8] sm:$0xff]  ;;  %v136_v21 = vld [vmem:[%s939_s1 + $0x300] sm:$0xff]  ;;  %v127_v23 = vld [vmem:[%s939_s1 + $0x2b8] sm:$0xff] }
  0x2e   :  { %280 = vmatpush.msrb.mxu2 %v137_v13  ;;  %162 = vmatmul.f32.vlgmr.msra.gmra.mxu0 %v33_v14  ;;  %v39_v24 = vld [vmem:[%s938_s0 + $0x30] sm:$0xff]  ;;  %v109_v27 = vld [vmem:[%s939_s1 + $0x228] sm:$0xff]  ;;  %v108_v29 = vld [vmem:[%s939_s1 + $0x220] sm:$0xff] }
  0x2f   :  { %232 = vmatpush.msrb.mxu0 %v113_v15  ;;  %252 = vmatpush.msrb.mxu1 %v129_v16  ;;  %v110_v25 = vld [vmem:[%s939_s1 + $0x230] sm:$0xff]  ;;  %v125_v28 = vld [vmem:[%s939_s1 + $0x2a8] sm:$0xff]  ;;  %v124_v30 = vld [vmem:[%s939_s1 + $0x2a0] sm:$0xff] }
  0x30   :  { %222 = vmatmul.f32.vlgmr.msra.gmra.mxu3 %v36_v17  ;;  %182 = vmatmul.f32.vlgmr.msra.gmra.mxu1 %v34_v18  ;;  %v126_v26 = vld [vmem:[%s939_s1 + $0x2b0] sm:$0xff]  ;;  %v107_v31 = vld [vmem:[%s939_s1 + $0x218] sm:$0xff]  ;;  %v105_v35 = vld [vmem:[%s939_s1 + $0x208] sm:$0xff] }
  0x31   :  { %233 = vmatpush.msrb.mxu0 %v112_v19  ;;  %253 = vmatpush.msrb.mxu1 %v128_v20  ;;  %v123_v32 = vld [vmem:[%s939_s1 + $0x298] sm:$0xff]  ;;  %v106_v33 = vld [vmem:[%s939_s1 + $0x210] sm:$0xff]  ;;  %v121_v36 = vld [vmem:[%s939_s1 + $0x288] sm:$0xff] }
  0x32   :  { %281 = vmatpush.msrb.mxu2 %v136_v21  ;;  %v122_v34 = vld [vmem:[%s939_s1 + $0x290] sm:$0xff]  ;;  %v104_v37 = vld [vmem:[%s939_s1 + $0x200] sm:$0xff]  ;;  %v38_v40 = vld [vmem:[%s938_s0 + $0x28] sm:$0xff] }
  0x33   :  { %234 = vmatpush.msrb.mxu0 %v111_v22  ;;  %254 = vmatpush.msrb.mxu1 %v127_v23  ;;  %v120_v38 = vld [vmem:[%s939_s1 + $0x280] sm:$0xff]  ;;  %v294_v41 = vld [vmem:[%s941_s3 + $0x38] sm:$0xff]  ;;  %v293_v42 = vld [vmem:[%s941_s3 + $0x30] sm:$0xff] }
  0x34   :  { %440 = vmatmul.msk.f32.vlgmr.msrb.gmra.mxu2 %vm142_vm0, %v39_v24  ;;  %v37_v39 = vld [vmem:[%s938_s0 + $0x20] sm:$0xff]  ;;  %311 = vmatpush.msrb.mxu3 %v294_v41  ;;  %v292_v43 = vld [vmem:[%s941_s3 + $0x28] sm:$0xff]  ;;  %v290_v45 = vld [vmem:[%s941_s3 + $0x18] sm:$0xff] }
  0x35   :  { %235 = vmatpush.msrb.mxu0 %v110_v25  ;;  %255 = vmatpush.msrb.mxu1 %v126_v26  ;;  %v291_v44 = vld [vmem:[%s941_s3 + $0x20] sm:$0xff]  ;;  %v289_v46 = vld [vmem:[%s941_s3 + $0x10] sm:$0xff]  ;;  %v288_v47 = vld [vmem:[%s941_s3 + $0x8] sm:$0xff]  ;;  %v395_v25 = vlaneseq }
  0x36   :  { %312 = vmatpush.msrb.mxu3 %v293_v42  ;;  %v287_v48 = vld [vmem:[%s941_s3] sm:$0xff]  ;;  %v331_v49 = vld [vmem:[%s943_s5 + $0x38] sm:$0xff]  ;;  %v330_v50 = vld [vmem:[%s943_s5 + $0x30] sm:$0xff] }
  0x37   :  { %236 = vmatpush.msrb.mxu0 %v109_v27  ;;  %256 = vmatpush.msrb.mxu1 %v125_v28  ;;  %v329_v51 = vld [vmem:[%s943_s5 + $0x28] sm:$0xff]  ;;  %v445_v52 = vld [vmem:[%s940_s2] ss:$0 sm:$0xff]  ;;  %v327_v55 = vld [vmem:[%s943_s5 + $0x18] sm:$0xff]  ;;  %v396_v26 = vand.u32 127, %v395_v25 }
  0x38   :  { %313 = vmatpush.msrb.mxu3 %v292_v43  ;;  %347 = vmatpush.msra.mxu2 %v331_v49  ;;  %v328_v53 = vld [vmem:[%s943_s5 + $0x20] sm:$0xff]  ;;  %v326_v6 = vld [vmem:[%s943_s5 + $0x10] sm:$0xff]  ;;  %v325_v7 = vld [vmem:[%s943_s5 + $0x8] sm:$0xff] }
  0x39   :  { %237 = vmatpush.msrb.mxu0 %v108_v29  ;;  %257 = vmatpush.msrb.mxu1 %v124_v30  ;;  %v324_v8 = vld [vmem:[%s943_s5] sm:$0xff]  ;;  %v367_v9 = vld [vmem:[%s945_s7 + $0x38] sm:$0xff]  ;;  %v366_v10 = vld [vmem:[%s945_s7 + $0x30] sm:$0xff]  ;;  %vm397_vm2 = vcmp.lt.s32.totalorder %v396_v26, 4 }
  0x3a   :  { %314 = vmatpush.msrb.mxu3 %v291_v44  ;;  %348 = vmatpush.msra.mxu2 %v330_v50  ;;  %v365_v11 = vld [vmem:[%s945_s7 + $0x28] sm:$0xff]  ;;  %v364_v12 = vld [vmem:[%s945_s7 + $0x20] sm:$0xff]  ;;  %v363_v13 = vld [vmem:[%s945_s7 + $0x18] sm:$0xff] }
  0x3b   :  { %238 = vmatpush.msrb.mxu0 %v107_v31  ;;  %258 = vmatpush.msrb.mxu1 %v123_v32  ;;  %v446_v14 = vld [vmem:[%s942_s4] ss:$0 sm:$0xff]  ;;  %v362_v18 = vld [vmem:[%s945_s7 + $0x10] sm:$0xff]  ;;  %v361_v19 = vld [vmem:[%s945_s7 + $0x8] sm:$0xff] }
  0x3c   :  { %315 = vmatpush.msrb.mxu3 %v290_v45  ;;  %349 = vmatpush.msra.mxu2 %v329_v51  ;;  %v360_v20 = vld [vmem:[%s945_s7] sm:$0xff] }
  0x3d   :  { %239 = vmatpush.msrb.mxu0 %v106_v33  ;;  %259 = vmatpush.msrb.mxu1 %v122_v34  ;;  %v447_v21 = vld [vmem:[%s944_s6] ss:$0 sm:$0xff]  ;;  %s479_s6 = smov [#allocation2]  }
  0x3e   :  { %316 = vmatpush.msrb.mxu3 %v289_v46  ;;  %350 = vmatpush.msra.mxu2 %v328_v53  ;;  %v448_v27 = vld [vmem:[%s946_s8] ss:$0 sm:$0xff]  ;;  %s429_s7 = sshll.u32 %s479_s6, 4  ;;  %s430_s7 = int_to_ptr.vmem [resolvable:$true] %s429_s7 }
  0x3f   :  { %240 = vmatpush.msrb.mxu0 %v105_v35  ;;  %260 = vmatpush.msrb.mxu1 %v121_v36 }
  0x40   :  { %317 = vmatpush.msrb.mxu3 %v288_v47  ;;  %351 = vmatpush.msra.mxu2 %v327_v55 }
  0x41   :  { %241 = vmatpush.msrb.mxu0 %v104_v37  ;;  %261 = vmatpush.msrb.mxu1 %v120_v38 }
  0x42   :  { %242 = vmatmul.f32.vlgmr.msrb.gmra.mxu0 %v37_v39  ;;  %262 = vmatmul.f32.vlgmr.msrb.gmra.mxu1 %v38_v40 }
  0x43   :  { %318 = vmatpush.msrb.mxu3 %v287_v48  ;;  %352 = vmatpush.msra.mxu2 %v326_v6 }
  0x45   :  { %353 = vmatpush.msra.mxu2 %v325_v7  ;;  %383 = vmatpush.msra.mxu3 %v367_v9 }
  0x47   :  { %354 = vmatpush.msra.mxu2 %v324_v8  ;;  %384 = vmatpush.msra.mxu3 %v366_v10 }
  0x49   :  { %385 = vmatpush.msra.mxu3 %v365_v11 }
  0x4b   :  { %386 = vmatpush.msra.mxu3 %v364_v12 }
  0x4d   :  { %387 = vmatpush.msra.mxu3 %v363_v13 }
  0x4f   :  { %388 = vmatpush.msra.mxu3 %v362_v18 }
  0x51   :  { %389 = vmatpush.msra.mxu3 %v361_v19 }
  0x53   :  { %390 = vmatpush.msra.mxu3 %v360_v20 }
  0xab   :  { %v163_v54 = vpop.f32.mrf.mxu0 }
  0xac   :  { %v164_v56 = vadd.f32 %v445_v52, %v163_v54 }
  0xad   :  { %v183_v57 = vpop.f32.mrf.mxu1 }
  0xae   :  { %v184_v58 = vadd.f32 %v183_v57, %v164_v56 }
  0xaf   :  { %v203_v59 = vpop.f32.mrf.mxu2 }
  0xb0   :  { %v204_v60 = vadd.f32 %v203_v59, %v184_v58 }
  0xb3   :  { %v223_v61 = vpop.f32.mrf.mxu3 }
  0xb4   :  { %v224_v62 = vadd.f32 %v223_v61, %v204_v60 }
  0xb7   :  { %v283_v2 = vpop.f32.mrf.mxu2 }
  0xbf   :  { %v243_v63 = vpop.f32.mrf.mxu0  ;;  %v263_v0 = vpop.f32.mrf.mxu1 }
  0xc0   :  { %v244_v1 = vadd.f32 %v243_v63, %v224_v62 }
  0xc2   :  { %v264_v3 = vadd.f32 %v263_v0, %v244_v1 }
  0xc4   :  { %v284_v4 = vadd.f32 %v283_v2, %v264_v3 }
  0xc6   :  { %v286_v5 = vmax.f32 %v284_v4, 0.0 }
  0xc8   :  { %441 = vmatmul.msk.f32.vlgmr.msrb.gmra.mxu3 %vm299_vm1, %v286_v5 }
 0x14b   :  { %v320_v15 = vpop.f32.mrf.mxu3 }
 0x14c   :  { %v321_v16 = vadd.f32 %v446_v14, %v320_v15 }
 0x14e   :  { %v323_v17 = vmax.f32 %v321_v16, 0.0 }
 0x150   :  { %442 = vmatmul.msk.f32.vlgmr.msra.gmra.mxu2 %vm299_vm1, %v323_v17 }
 0x1d3   :  { %v356_v22 = vpop.f32.mrf.mxu2 }
 0x1d4   :  { %v357_v23 = vadd.f32 %v447_v21, %v356_v22 }
 0x1d6   :  { %v359_v24 = vmax.f32 %v357_v23, 0.0 }
 0x1d8   :  { %443 = vmatmul.msk.f32.vlgmr.msra.gmra.mxu3 %vm299_vm1, %v359_v24 }
 0x25b   :  { %v392_v28 = vpop.f32.mrf.mxu3 }
 0x25c   :  { %v393_v29 = vadd.f32 %v448_v27, %v392_v28 }
 0x25e   :  { %v398_v30 = vsel %vm397_vm2, %v393_v29, -inf }
 0x25f   :  { %399 = vmax.xlane.f32.xlu0 %v398_v30 }
 0x2d2   :  { %v400_v31 = vpop.xlane.xlu0 %399 }
 0x2d3   :  { %v401_v32 = vsub.f32 %v393_v29, %v400_v31 }
 0x2d5   :  { %v402_v33 = vsel %vm397_vm2, %v401_v32, -inf }
 0x2d6   :  { %v403_v34 = vmul.f32 1.442695, %v402_v33 }
 0x2d8   :  { %449 = vpow2.f32 %v403_v34 }
 0x2de   :  { %v450_v35 = vpop.eup %449 }
 0x2df   :  { %405 = vadd.xlane.f32.xlu0 %v450_v35 }
 0x352   :  { %v406_v36 = vpop.xlane.xlu0 %405 }
 0x353   :  { %451 = vrcp.f32 %v406_v36  ;;  %v418_v40 = vand.u32 2147483648, %v406_v36  ;;  %v416_v42 = vand.u32 2147483647, %v406_v36  ;;  %vm412_vm4 = vweird.f32 %v406_v36 }
 0x355   :  { %v419_v44 = vor.u32 1.1754944e-38, %v418_v40  ;;  %vm417_vm6 = vcmp.eq.f32.partialorder %v416_v42, 8.507059e+37 }
 0x359   :  { %v452_v37 = vpop.eup %451 }
 0x35a   :  { %v408_v38 = vmul.f32 %v452_v37, %v406_v36  ;;  %vm413_vm3 = vweird.f32 %v452_v37 }
 0x35b   :  { %vm414_vm5 = vmor %vm412_vm4, %vm413_vm3 }
 0x35c   :  { %v409_v39 = vsub.f32 1.0, %v408_v38 }
 0x35e   :  { %v410_v41 = vmul.f32 %v452_v37, %v409_v39 }
 0x360   :  { %v411_v43 = vadd.f32 %v452_v37, %v410_v41 }
 0x362   :  { %v415_v45 = vsel %vm414_vm5, %v452_v37, %v411_v43 }
 0x363   :  { %v420_v46 = vsel %vm417_vm6, %v419_v44, %v415_v45 }
 0x364   :  { %v421_v47 = vmul.f32 %v450_v35, %v420_v46 }
 0x366   :  { %v422_v48 = vsel %vm397_vm2, %v421_v47, %v393_v29 }
 0x367   :  { %423 = vst [vmem:[#allocation2] sm:$0xff] %v422_v48 }
 0x368   :  { %434 = dma.vmem_to_hbm [thread:$0]  %s430_s7, 128, %s432_s13, [#allocation3]  }
 0x369   :  { %477 = dma.done.wait [#allocation3], 128  }
 0x36a   :  { %478 = vsyncadd [#allocation3], 4294967168 }
 0x36b   :  { %439 = vsyncpa [#allocation3], 1 }

</bundles_post_ra>
